<compile_context>
chip_gen: v7x
topology: tpu7x:2x2x1
jax: 0.10.0
libtpu: 0.0.40
codegen_flags: <defaults>
</compile_context>

<pallas_src>
import jax
import jax.numpy as jnp
from jax.experimental import pallas as pl
from jax.experimental.pallas import tpu as pltpu


# ---------------------------------------------------------------------------
# Path A: small vocabulary -> token table resident in VMEM, in-kernel gather.
# ---------------------------------------------------------------------------
def _resident_kernel(ids_ref, tok_ref, pos_ref, out_ref):
    # ids_ref: (B*S,) int32 in SMEM (scalar prefetch)
    # tok_ref: (V, D) token table, resident in VMEM (same block every step)
    # pos_ref: (Sc, D) position rows for this sequence chunk
    # out_ref: (1, Sc, D) output block for (batch b, chunk c)
    b = pl.program_id(0)
    c = pl.program_id(1)
    n_chunks = pl.num_programs(1)
    chunk = out_ref.shape[1]
    seq = n_chunks * chunk
    base = b * seq + c * chunk

    rows = []
    for s in range(chunk):                          # static unroll (chunk kept small)
        tok = ids_ref[base + s]                     # scalar read from SMEM
        rows.append(tok_ref[pl.ds(tok, 1), :])      # (1, D) dynamic sublane read
    gathered = jnp.concatenate(rows, axis=0)        # (Sc, D)

    # Single fused, lane-dense add + store.
    out_ref[0, :, :] = (gathered + pos_ref[...]).astype(out_ref.dtype)


# ---------------------------------------------------------------------------
# Path B: large vocabulary -> table stays in HBM, chunked + double-buffered
# row-gather DMAs with one aggregated semaphore wait per chunk.
# ---------------------------------------------------------------------------
def _hbm_gather_kernel(ids_ref, tok_hbm_ref, pos_ref, out_ref, gbuf_ref, sem_ref):
    # ids_ref:     (B*S,) int32 in SMEM (scalar prefetch)
    # tok_hbm_ref: (V, D) token table left in HBM (pl.ANY)
    # pos_ref:     (Sc, D) position rows for this chunk (VMEM)
    # out_ref:     (1, Sc, D) output block
    # gbuf_ref:    (2, Sc, D) VMEM double-buffered gather buffer (scratch)
    # sem_ref:     (2,) DMA semaphores, one per buffer slot (scratch)
    b = pl.program_id(0)
    c = pl.program_id(1)
    n_chunks = pl.num_programs(1)
    chunk = out_ref.shape[1]
    seq = n_chunks * chunk

    def issue_chunk(cc, slot):
        base = b * seq + cc * chunk
        for s in range(chunk):                      # static unroll over the chunk
            tok = ids_ref[base + s]                 # scalar reads happen BEFORE waits
            pltpu.make_async_copy(
                tok_hbm_ref.at[pl.ds(tok, 1), :],   # (1, D) HBM row
                gbuf_ref.at[slot, pl.ds(s, 1), :],  # (1, D) VMEM slot row
                sem_ref.at[slot],                   # all rows of a chunk -> one sem
            ).start()

    # Prime the pipeline at the start of every batch row.
    @pl.when(c == 0)
    def _():
        issue_chunk(0, 0)

    # Prefetch the next chunk of this batch row before waiting on the current.
    @pl.when(c + 1 < n_chunks)
    def _():
        issue_chunk(c + 1, (c + 1) % 2)

    slot = c % 2
    # Aggregated wait: one wait covering all `chunk` row DMAs that signalled
    # sem[slot] (wait amount = bytes of a (Sc, D) buffer = sum of the row DMAs).
    pltpu.make_async_copy(gbuf_ref.at[slot], gbuf_ref.at[slot], sem_ref.at[slot]).wait()

    # Fused, lane-dense add + store.
    out_ref[0, :, :] = (gbuf_ref[slot] + pos_ref[...]).astype(out_ref.dtype)


def _pick_chunk(seq, d, itemsize, *, target_bytes, max_rows):
    """Largest chunk that is a multiple of 8, divides seq, and fits the budget.

    Falls back to the full sequence (a full-extent block is always legal)."""
    if seq <= max_rows and seq * d * itemsize <= target_bytes:
        return seq
    best = None
    sc = 8
    while sc < seq:
        if seq % sc == 0 and sc <= max_rows and sc * d * itemsize <= target_bytes:
            best = sc
        sc += 8
    return best if best is not None else seq


def embedding_layer(x, token_table, position_table, *,
                    resident_table_bytes=4 * 1024 * 1024,
                    chunk_rows=None):
    """x: (B, S) integer token ids -> (B, S, D) embeddings."""
    B, S = x.shape
    V, D = token_table.shape
    assert position_table.shape[0] >= S, "sequence longer than position table"
    assert position_table.shape[1] == D
    dtype = token_table.dtype
    itemsize = jnp.dtype(dtype).itemsize

    pos_tab = position_table[:S]                    # positions = arange(S)
    ids = x.reshape(-1).astype(jnp.int32)           # 1-D SMEM scalar-prefetch array

    use_resident = V * D * itemsize <= resident_table_bytes

    if chunk_rows is not None:
        Sc = chunk_rows
    elif use_resident:
        Sc = _pick_chunk(S, D, itemsize, target_bytes=1 << 20, max_rows=64)
    else:
        Sc = _pick_chunk(S, D, itemsize, target_bytes=512 * 1024, max_rows=128)
    assert S % Sc == 0, "sequence length must be divisible by the chunk size"
    n_chunks = S // Sc

    out_shape = jax.ShapeDtypeStruct((B, S, D), dtype)
    pos_spec = pl.BlockSpec((Sc, D), lambda b, c, ids_ref: (c, 0))
    out_spec = pl.BlockSpec((1, Sc, D), lambda b, c, ids_ref: (b, c, 0))

    if use_resident:
        return pl.pallas_call(
            _resident_kernel,
            out_shape=out_shape,
            grid_spec=pltpu.PrefetchScalarGridSpec(
                num_scalar_prefetch=1,
                grid=(B, n_chunks),
                in_specs=[
                    pl.BlockSpec((V, D), lambda b, c, ids_ref: (0, 0)),  # resident
                    pos_spec,
                ],
                out_specs=out_spec,
            ),
            compiler_params=pltpu.CompilerParams(
                dimension_semantics=("parallel", "parallel"),
            ),
        )(ids, token_table, pos_tab)

    return pl.pallas_call(
        _hbm_gather_kernel,
        out_shape=out_shape,
        grid_spec=pltpu.PrefetchScalarGridSpec(
            num_scalar_prefetch=1,
            grid=(B, n_chunks),
            in_specs=[
                pl.BlockSpec(memory_space=pl.ANY),   # token table stays in HBM
                pos_spec,
            ],
            out_specs=out_spec,
            scratch_shapes=[
                pltpu.VMEM((2, Sc, D), dtype),       # double-buffered gather buffer
                pltpu.SemaphoreType.DMA((2,)),       # one DMA sem per buffer slot
            ],
        ),
        compiler_params=pltpu.CompilerParams(
            # The chunk axis carries double-buffer state across steps -> arbitrary.
            dimension_semantics=("parallel", "arbitrary"),
        ),
    )(ids, token_table, pos_tab)


if __name__ == "__main__":
    # Small shapes consistent with the module's forward.
    vocab_size, embed_dim, seq_len, batch = 64, 128, 8, 2

    key = jax.random.PRNGKey(0)
    k_tok, k_pos, k_x = jax.random.split(key, 3)

    token_table = jax.random.normal(k_tok, (vocab_size, embed_dim), jnp.float32)
    position_table = jax.random.normal(k_pos, (seq_len, embed_dim), jnp.float32)
    x = jax.random.randint(k_x, (batch, seq_len), 0, vocab_size, dtype=jnp.int32)

    ref = token_table[x] + position_table[jnp.arange(seq_len)][None, :, :]

    # Path A (default for these shapes): VMEM-resident token table.
    out = jax.block_until_ready(embedding_layer(x, token_table, position_table))
    assert out.shape == (batch, seq_len, embed_dim)
    assert out.dtype == jnp.float32
    assert jnp.allclose(out, ref, atol=1e-6, rtol=1e-6)

    # Path B: force the HBM gather path with a longer sequence so the chunked,
    # double-buffered DMA pipeline (4 chunks of 8 rows) is exercised too.
    seq2 = 32
    k_pos2, k_x2 = jax.random.split(k_x)
    position_table2 = jax.random.normal(k_pos2, (seq2, embed_dim), jnp.float32)
    x2 = jax.random.randint(k_x2, (batch, seq2), 0, vocab_size, dtype=jnp.int32)
    ref2 = token_table[x2] + position_table2[jnp.arange(seq2)][None, :, :]
    out2 = jax.block_until_ready(
        embedding_layer(x2, token_table, position_table2,
                        resident_table_bytes=0, chunk_rows=8))
    assert jnp.allclose(out2, ref2, atol=1e-6, rtol=1e-6)

    print("KERNEL_OK")
</pallas_src>

<mosaic_0001>
module attributes {stable_mosaic.version = 11 : i64} {
  func.func @_resident_kernel(%arg0: i32, %arg1: i32, %arg2: memref<16xi32, #tpu.memory_space<smem>>, %arg3: memref<64x128xf32, #tpu.memory_space<vmem>>, %arg4: memref<8x128xf32, #tpu.memory_space<vmem>>, %arg5: memref<1x8x128xf32, #tpu.memory_space<vmem>>) attributes {dimension_semantics = [#tpu.dimension_semantics<parallel>, #tpu.dimension_semantics<parallel>], iteration_bounds = array<i64: 2, 1>, scalar_prefetch = 1 : i64, scratch_operands = 0 : i64, tpu.core_type = #tpu.core_type<tc>, window_params = [{pipeline_mode = #tpu.pipeline_mode<synchronous>, transform_indices = @transform_0, window_bounds = array<i64: 64, 128>}, {transform_indices = @transform_1, window_bounds = array<i64: 8, 128>}, {transform_indices = @transform_2, window_bounds = array<i64: 1, 8, 128>}]} {
    %c8_i32 = arith.constant 8 : i32
    %0 = arith.muli %arg0, %c8_i32 : i32
    %c8_i32_0 = arith.constant 8 : i32
    %1 = arith.muli %arg1, %c8_i32_0 : i32
    %2 = arith.addi %0, %1 : i32
    %c0_i32 = arith.constant 0 : i32
    %3 = arith.addi %2, %c0_i32 : i32
    %4 = arith.index_cast %3 : i32 to index
    %5 = memref.load %arg2[%4] : memref<16xi32, #tpu.memory_space<smem>>
    %6 = arith.index_cast %5 : i32 to index
    %c0 = arith.constant 0 : index
    %7 = vector.load %arg3[%6, %c0] : memref<64x128xf32, #tpu.memory_space<vmem>>, vector<1x128xf32>
    %c1_i32 = arith.constant 1 : i32
    %8 = arith.addi %2, %c1_i32 : i32
    %9 = arith.index_cast %8 : i32 to index
    %10 = memref.load %arg2[%9] : memref<16xi32, #tpu.memory_space<smem>>
    %11 = arith.index_cast %10 : i32 to index
    %c0_1 = arith.constant 0 : index
    %12 = vector.load %arg3[%11, %c0_1] : memref<64x128xf32, #tpu.memory_space<vmem>>, vector<1x128xf32>
    %c2_i32 = arith.constant 2 : i32
    %13 = arith.addi %2, %c2_i32 : i32
    %14 = arith.index_cast %13 : i32 to index
    %15 = memref.load %arg2[%14] : memref<16xi32, #tpu.memory_space<smem>>
    %16 = arith.index_cast %15 : i32 to index
    %c0_2 = arith.constant 0 : index
    %17 = vector.load %arg3[%16, %c0_2] : memref<64x128xf32, #tpu.memory_space<vmem>>, vector<1x128xf32>
    %c3_i32 = arith.constant 3 : i32
    %18 = arith.addi %2, %c3_i32 : i32
    %19 = arith.index_cast %18 : i32 to index
    %20 = memref.load %arg2[%19] : memref<16xi32, #tpu.memory_space<smem>>
    %21 = arith.index_cast %20 : i32 to index
    %c0_3 = arith.constant 0 : index
    %22 = vector.load %arg3[%21, %c0_3] : memref<64x128xf32, #tpu.memory_space<vmem>>, vector<1x128xf32>
    %c4_i32 = arith.constant 4 : i32
    %23 = arith.addi %2, %c4_i32 : i32
    %24 = arith.index_cast %23 : i32 to index
    %25 = memref.load %arg2[%24] : memref<16xi32, #tpu.memory_space<smem>>
    %26 = arith.index_cast %25 : i32 to index
    %c0_4 = arith.constant 0 : index
    %27 = vector.load %arg3[%26, %c0_4] : memref<64x128xf32, #tpu.memory_space<vmem>>, vector<1x128xf32>
    %c5_i32 = arith.constant 5 : i32
    %28 = arith.addi %2, %c5_i32 : i32
    %29 = arith.index_cast %28 : i32 to index
    %30 = memref.load %arg2[%29] : memref<16xi32, #tpu.memory_space<smem>>
    %31 = arith.index_cast %30 : i32 to index
    %c0_5 = arith.constant 0 : index
    %32 = vector.load %arg3[%31, %c0_5] : memref<64x128xf32, #tpu.memory_space<vmem>>, vector<1x128xf32>
    %c6_i32 = arith.constant 6 : i32
    %33 = arith.addi %2, %c6_i32 : i32
    %34 = arith.index_cast %33 : i32 to index
    %35 = memref.load %arg2[%34] : memref<16xi32, #tpu.memory_space<smem>>
    %36 = arith.index_cast %35 : i32 to index
    %c0_6 = arith.constant 0 : index
    %37 = vector.load %arg3[%36, %c0_6] : memref<64x128xf32, #tpu.memory_space<vmem>>, vector<1x128xf32>
    %c7_i32 = arith.constant 7 : i32
    %38 = arith.addi %2, %c7_i32 : i32
    %39 = arith.index_cast %38 : i32 to index
    %40 = memref.load %arg2[%39] : memref<16xi32, #tpu.memory_space<smem>>
    %41 = arith.index_cast %40 : i32 to index
    %c0_7 = arith.constant 0 : index
    %42 = vector.load %arg3[%41, %c0_7] : memref<64x128xf32, #tpu.memory_space<vmem>>, vector<1x128xf32>
    %43 = tpu.concatenate %7, %12, %17, %22, %27, %32, %37, %42 in 0 : vector<1x128xf32>, vector<1x128xf32>, vector<1x128xf32>, vector<1x128xf32>, vector<1x128xf32>, vector<1x128xf32>, vector<1x128xf32>, vector<1x128xf32> -> vector<8x128xf32>
    %c0_8 = arith.constant 0 : index
    %c0_9 = arith.constant 0 : index
    %44 = vector.load %arg4[%c0_8, %c0_9] : memref<8x128xf32, #tpu.memory_space<vmem>>, vector<8x128xf32>
    %45 = arith.addf %43, %44 : vector<8x128xf32>
    %c0_10 = arith.constant 0 : index
    %c0_11 = arith.constant 0 : index
    %c0_12 = arith.constant 0 : index
    %46 = vector.load %arg5[%c0_10, %c0_11, %c0_12] : memref<1x8x128xf32, #tpu.memory_space<vmem>>, vector<1x8x128xf32>
    %47 = vector.shape_cast %46 : vector<1x8x128xf32> to vector<8x128xf32>
    %48 = vector.shape_cast %45 : vector<8x128xf32> to vector<1x8x128xf32>
    tpu.vector_store %arg5[%c0_10, %c0_11, %c0_12], %48 {strides = array<i32>} : memref<1x8x128xf32, #tpu.memory_space<vmem>>, vector<1x8x128xf32>,
    return
  }
  func.func @transform_0(%arg0: i32, %arg1: i32, %arg2: memref<16xi32, #tpu.memory_space<smem>>) -> (i32, i32) {
    %c0_i32 = arith.constant 0 : i32
    %c0_i32_0 = arith.constant 0 : i32
    %c0_i32_1 = arith.constant 0 : i32
    return %c0_i32, %c0_i32_0 : i32, i32
  }
  func.func @transform_1(%arg0: i32, %arg1: i32, %arg2: memref<16xi32, #tpu.memory_space<smem>>) -> (i32, i32) {
    %c0_i32 = arith.constant 0 : i32
    %c0_i32_0 = arith.constant 0 : i32
    return %arg1, %c0_i32 : i32, i32
  }
  func.func @transform_2(%arg0: i32, %arg1: i32, %arg2: memref<16xi32, #tpu.memory_space<smem>>) -> (i32, i32, i32) {
    %c0_i32 = arith.constant 0 : i32
    %c0_i32_0 = arith.constant 0 : i32
    return %arg0, %arg1, %c0_i32 : i32, i32, i32
  }
}

</mosaic_0001>

<bundles_post_ra>
// kernel: tpu_custom_call.1
= control target key start
LH: loop header
LB: loop body
LE: loop exit
PB: predicated region body
PF: predicated region fallthrough
CT: control target
= control target key end

     0   :  { %s832_s0 = inlined_call_operand.hbm [shape: s32[16], index: 0, kind: input, shape index: {}]   ;;  %s833_s1 = inlined_call_operand.hbm [shape: f32[64,128], index: 1, kind: input, shape index: {}]   ;;  %s834_s2 = inlined_call_operand.hbm [shape: f32[8,128], index: 2, kind: input, shape index: {}]   ;;  %s835_s3 = inlined_call_operand.hbm [shape: f32[2,8,128], index: 3, kind: output, shape index: {}]  }
   0x1   :  { %s444_s14 = scalar_lea.hbm %s832_s0, 16 }
   0x2   :  { %p445_p0 = scmp.ne.s32.totalorder %s832_s0, %s444_s14  ;;  %p448_p1 = scmp.lt.u32.totalorder %s444_s14, %s832_s0 }
   0x4   :  { %p450_p2 = pnand %p448_p1, %p445_p0 }
   0x6   :  { %453 = shalt.err (!%p450_p2)  }
   0x7   :  { %s600_s19 = smov [#allocation3]  }
   0x8   :  { %9 = dma.hbm_to_smem %s832_s0, 16, %s600_s19, [#allocation2] }
   0x9   :  { %562 = dma.done.wait [#allocation2], 16 }
   0xa   :  { %563 = vsyncadd [#allocation2], 4294967280 }
   0xb   :  { %11 = sfence }
   0xc   :  { %12 = vsyncpa [#allocation5], 0 }
   0xd   :  { %13 = vsyncpa [#allocation8], 0 }
   0xe   :  { %14 = vsyncpa [#allocation6], 0 }
   0xf   :  { %16 = vsyncpa [#allocation6 + $0x1], 0  ;;  %s638_s22 = smov 0   ;;  %s640_s23 = smov 0  }
  0x10   :  { %s642_s24 = smov 0   ;;  %s644_s25 = smov 0  }
  0x11   :  { %s646_s26 = smov 0   ;;  %s648_s27 = smov 0  }
  0x12 LB: > { %s351_s0 = sadd.s32 4294967295, %s598_s27   ;;  %s352_s28 = sadd.s32 4294967294, %s598_s27   ;;  %s598_s27 = sphi %s648_s27, %s22_s27   ;;  %s594_s26 = sphi %s646_s26, %s855_s26   ;;  %s590_s25 = sphi %s644_s25, %s854_s25   ;;  %s586_s24 = sphi %s642_s24, %s853_s24   ;;  %s582_s23 = sphi %s640_s23, %s852_s23   ;;  %s578_s22 = sphi %s638_s22, %s851_s22  }
  0x13   : > { %s34_s29 = sadd.s32 1, %s594_s26  ;;  %s90_s30 = sadd.s32 1, %s586_s24 }
  0x14   : > { %p36_p3 = scmp.ge.s32.totalorder %s34_s29, 2  ;;  %p100_p4 = scmp.ne.s32.totalorder %s586_s24, %s582_s23 }
  0x15   : > { %p101_p5 = scmp.eq.s32.totalorder %s351_s0, 1  ;;  %p106_p6 = scmp.ne.s32.totalorder %s582_s23, %s578_s22 }
  0x16   : > { %s857_s29 = smov (%p36_p3, %s34_s29), 0  ;;  %p107_p8 = scmp.eq.s32.totalorder %s352_s28, 1 }
  0x17   : > { %p678_p7 = por %p101_p5, %p100_p4  ;;  %s85_s5 = ssub.s32 %s594_s26, %s857_s29 }
  0x18   : > { %p353_p9 = scmp.ge.s32.totalorder %s598_s27, 1  ;;  %p88_p10 = scmp.eq.s32.totalorder %s85_s5, 0 }
  0x19   : > { %s840_s4 = scalar_select %p678_p7, 1, 0 }
  0x1a   : > { %p685_p11 = por %p107_p8, %p106_p6  ;;  %p114_p12 = scmp.lt.s32.totalorder %s598_s27, 3 }
  0x1b   : > { %s691_s7 = scalar_select %p88_p10, %s586_s24, %s90_s30  }
  0x1c   : > { %s841_s6 = scalar_select %p685_p11, 1, 0 }
  0x1d   : > { %p693_p13 = pnand %p353_p9, %p114_p12  ;;  %p697_p0 = scmp.eq.s32.totalorder %s351_s0, 0 }
  0x1e   : > { %s601_s10 = smov [#allocation4]   ;;  %s602_s13 = smov [#allocation7]  }
  0x1f   : > { %s842_s8 = scalar_select %p693_p13, 1, 0 }
  0x20   : > { %s843_s9 = scalar_select %p697_p0, 1, 0 }
  0x21   : > { %p375_p1 = pneg %p693_p13  ;;  %s126_s11 = sshll.u32 %s601_s10, 4  ;;  %s127_s11 = int_to_ptr.vmem [resolvable:$true] %s126_s11 }
  0x22   : > { %s142_s14 = sshll.u32 %s602_s13, 4  ;;  %s454_s17 = scalar_lea.hbm %s833_s1, 1024  ;;  %s709_s14 = int_to_ptr.vmem [resolvable:$true] %s142_s14 }
  0x23   : > { %p705_p2 = pnand %p697_p0, %p375_p1  ;;  %p455_p3 = scmp.ne.s32.totalorder %s833_s1, %s454_s17 }
  0x24   : > { %p461_p8 = scmp.lt.u32.totalorder %s454_s17, %s833_s1 }
  0x25   : > { %p456_p4 = pneg %p705_p2 }
  0x27   : > { %p457_p5 = pnand %p456_p4, %p455_p3 }
  0x29   : > { %p458_p6 = pneg %p457_p5 }
  0x2b   : > { %p463_p9 = pnand %p461_p8, %p458_p6 }
  0x2d   : > { %466 = shalt.err (!%p463_p9)
}
  0x2e   : > { %s467_s0 = scalar_lea.vmem %s127_s11, 1024  ;;  %p475_p11 = scmp.lt.s32.totalorder %s127_s11, %s127_s11 }
  0x2f   : > { %p468_p10 = scmp.ne.s32.totalorder %s127_s11, %s467_s0  ;;  %p476_p7 = scmp.lt.s32.totalorder %s467_s0, %s467_s0 }
  0x31   : > { %p470_p12 = pnand %p468_p10, %p456_p4  ;;  %p477_p0 = por %p476_p7, %p475_p11 }
  0x33   : > { %p471_p1 = pneg %p470_p12 }
  0x35   : > { %p478_p13 = pnand %p477_p0, %p471_p1 }
  0x37   : > { %481 = shalt.err (!%p478_p13)
}
  0x38   : > { %s603_s28 = smov 128   ;;  %s604_s30 = smov 8  }
  0x39   : > { %378 = dma.hbm_to_vmem [thread:$0]  (!%p705_p2), %s833_s1, 1024, %s127_s11, [#allocation5], %s603_s28, %s603_s28, %s604_s30  }
  0x3a   : > { %s482_s16 = scalar_lea.hbm %s834_s2, 128 }
  0x3b   : > { %p483_p3 = scmp.ne.s32.totalorder %s834_s2, %s482_s16  ;;  %p489_p13 = scmp.lt.u32.totalorder %s482_s16, %s834_s2 }
  0x3d   : > { %p485_p7 = pnand %p483_p3, %p456_p4 }
  0x3f   : > { %p486_p11 = pneg %p485_p7 }
  0x41   : > { %p491_p0 = pnand %p489_p13, %p486_p11 }
  0x43   : > { %494 = shalt.err (!%p491_p0)
}
  0x44   : > { %s495_s11 = scalar_lea.vmem %s709_s14, 128  ;;  %p503_p9 = scmp.lt.s32.totalorder %s709_s14, %s709_s14 }
  0x45   : > { %p496_p5 = scmp.ne.s32.totalorder %s709_s14, %s495_s11  ;;  %p504_p10 = scmp.lt.s32.totalorder %s495_s11, %s495_s11 }
  0x47   : > { %p498_p6 = pnand %p496_p5, %p456_p4  ;;  %p505_p12 = por %p504_p10, %p503_p9 }
  0x49   : > { %p499_p8 = pneg %p498_p6 }
  0x4b   : > { %p506_p1 = pnand %p505_p12, %p499_p8 }
  0x4d   : > { %509 = shalt.err (!%p506_p1)
}
  0x4e   : > { %381 = dma.hbm_to_vmem [thread:$0]  (!%p705_p2), %s834_s2, 128, %s709_s14, [#allocation8]  }
  0x4f   : > { %p845_p3 = scmp.ne.s32.totalorder %s842_s8, 0 }
  0x50   : > { %p846_p7 = scmp.ne.s32.totalorder (!%p845_p3), %s843_s9, 0 }
  0x51   : > { %155 = sbr.rel (%p845_p3) target bundleno = 131 (0x83), region = 28 }
  0x58   : > { %565 = dma.done.wait (%p846_p7), [#allocation5], 1024  }
  0x59   : > { %567 = vsyncadd (%p846_p7), [#allocation5], 4294966272 }
  0x5a   : > { %569 = dma.done.wait (%p846_p7), [#allocation8], 128  }
  0x5b   : > { %571 = vsyncadd (%p846_p7), [#allocation8], 4294967168  ;;  %s360_s12 = sshll.u32 %s590_s25, 3  ;;  %vm231_vm0 = vcmask 1040384   ;;  %vm233_vm1 = vcmask 1041408   ;;  %vm235_vm2 = vcmask 1042432  }
  0x5c   : > { %s179_s28 = sld [smem:[#allocation3 + %s360_s12]]  ;;  %s182_s30 = sadd.s32 1, %s360_s12  ;;  %vm237_vm3 = vcmask 1043456   ;;  %vm239_vm4 = vcmask 1044480   ;;  %vm241_vm5 = vcmask 1045504   ;;  %vm243_vm6 = vcmask 1046528  }
  0x5d   : > { %s183_s8 = sld [smem:[#allocation3 + %s182_s30]]  ;;  %s186_s5 = sadd.s32 2, %s360_s12  ;;  %v245_v20 = vld [vmem:[#allocation7] sm:$0xff] }
  0x5e   : > { %s187_s10 = sld [smem:[#allocation3 + %s186_s5]]  ;;  %s190_s13 = sadd.s32 3, %s360_s12 }
  0x5f   : > { %s191_s15 = sld [smem:[#allocation3 + %s190_s13]]  ;;  %s194_s16 = sadd.s32 4, %s360_s12 }
  0x60   : > { %s195_s17 = sld [smem:[#allocation3 + %s194_s16]]  ;;  %s198_s18 = sadd.s32 5, %s360_s12 }
  0x61   : > { %s199_s19 = sld [smem:[#allocation3 + %s198_s18]]  ;;  %s202_s20 = sadd.s32 6, %s360_s12 }
  0x62   : > { %s206_s11 = sadd.s32 7, %s360_s12  ;;  %s770_s9 = sld [smem:[#allocation3 + %s202_s20]] }
  0x63   : > { %s180_s21 = scalar_lea.vmem [#allocation4], %s179_s28  ;;  %s184_s0 = scalar_lea.vmem [#allocation4], %s183_s8 }
  0x64   : > { %v181_v0 = vld [vmem:[%s180_s21] sm:$0x1]  ;;  %s207_s14 = sld [smem:[#allocation3 + %s206_s11]]  ;;  %s188_s30 = scalar_lea.vmem [#allocation4], %s187_s10 }
  0x65   : > { %v185_v1 = vld [vmem:[%s184_s0] sm:$0x1]  ;;  %s847_s5 = sand.u32 1, %s582_s23   ;;  %s192_s16 = scalar_lea.vmem [#allocation4], %s191_s15 }
  0x66   : > { %v189_v2 = vld [vmem:[%s188_s30] sm:$0x1]  ;;  %v211_v3 = vrot.slane %v185_v1, 7  ;;  %s774_s13 = sshll.u32 %s847_s5, 3  ;;  %s196_s12 = scalar_lea.vmem [#allocation4], %s195_s17 }
  0x67   : > { %v193_v4 = vld [vmem:[%s192_s16] sm:$0x1]  ;;  %v214_v5 = vrot.slane %v189_v2, 6  ;;  %s200_s28 = scalar_lea.vmem [#allocation4], %s199_s19  ;;  %s175_s15 = scalar_lea.vmem [#allocation9], %s774_s13 }
  0x68   : > { %v197_v6 = vld [vmem:[%s196_s12] sm:$0x1]  ;;  %v217_v7 = vrot.slane %v193_v4, 5  ;;  %v232_v8 = vsel %vm231_vm0, %v181_v0, %v211_v3  ;;  %s204_s8 = scalar_lea.vmem [#allocation4], %s770_s9  ;;  %s263_s17 = sshll.u32 %s175_s15, 4  ;;  %s780_s17 = int_to_ptr.vmem [resolvable:$true] %s263_s17 }
  0x69   : > { %v201_v9 = vld [vmem:[%s200_s28] sm:$0x1]  ;;  %v220_v10 = vrot.slane %v197_v6, 4  ;;  %v234_v11 = vsel %vm233_vm1, %v232_v8, %v214_v5  ;;  %s362_s18 = sshll.u32 %s590_s25, 7  ;;  %s848_s11 = smov %s847_s5 }
  0x6a   : > { %v223_v12 = vrot.slane %v201_v9, 3  ;;  %v236_v13 = vsel %vm235_vm2, %v234_v11, %v217_v7  ;;  %v205_v14 = vld [vmem:[%s204_s8] sm:$0x1]  ;;  %s208_s10 = scalar_lea.vmem [#allocation4], %s207_s14  ;;  %s785_s14 = scalar_lea.hbm %s835_s3, %s362_s18 }
  0x6b   : > { %v238_v15 = vsel %vm237_vm3, %v236_v13, %v220_v10  ;;  %v209_v16 = vld [vmem:[%s208_s10] sm:$0x1]  ;;  %v226_v17 = vrot.slane %v205_v14, 2  ;;  %s249_s9 = scalar_lea.sflag [#allocation6], %s848_s11  ;;  %s510_s21 = scalar_lea.vmem %s780_s17, 128 }
  0x6c   : > { %v240_v18 = vsel %vm239_vm4, %v238_v15, %v223_v12  ;;  %v229_v19 = vrot.slane %v209_v16, 1  ;;  %p511_p2 = scmp.ne.s32.totalorder %s780_s17, %s510_s21  ;;  %p849_p4 = scmp.ne.s32.totalorder %s840_s4, 0 }
  0x6d   : > { %v242_v21 = vsel %vm241_vm5, %v240_v18, %v226_v17  ;;  %s605_s25 = smov [#allocation9]  }
  0x6e   : > { %v244_v22 = vsel %vm243_vm6, %v242_v21, %v229_v19  ;;  %p512_p11 = pnand %p511_p2, %p849_p4  ;;  %s514_s0 = sshll.u32 %s605_s25, 4  ;;  %s515_s0 = int_to_ptr.vmem [resolvable:$false] %s514_s0 }
  0x6f   : > { %v246_v23 = vadd.f32 %v245_v20, %v244_v22  ;;  %s516_s30 = scalar_lea.vmem %s515_s0, 256  ;;  %p517_p0 = scmp.lt.s32.totalorder %s780_s17, %s515_s0 }
  0x70   : > { %p513_p13 = pneg %p512_p11  ;;  %p518_p5 = scmp.lt.s32.totalorder %s516_s30, %s510_s21 }
  0x71   : > { %247 = vst [vmem:[%s175_s15] sm:$0xff] %v246_v23 }
  0x72   : > { %p519_p6 = por %p518_p5, %p517_p0 }
  0x74   : > { %p520_p8 = pnand %p519_p6, %p513_p13 }
  0x76   : > { %523 = shalt.err (!%p520_p8)
}
  0x77   : > { %s524_s5 = scalar_lea.hbm %s785_s14, 128  ;;  %s528_s12 = scalar_lea.hbm %s835_s3, 256 }
  0x78   : > { %p525_p9 = scmp.ne.s32.totalorder %s785_s14, %s524_s5  ;;  %p529_p1 = scmp.lt.u32.totalorder %s785_s14, %s835_s3 }
  0x79   : > { %p530_p3 = scmp.lt.u32.totalorder %s528_s12, %s524_s5  ;;  %p532_p2 = scmp.lt.u32.totalorder %s524_s5, %s785_s14 }
  0x7a   : > { %p526_p10 = pnand %p525_p9, %p849_p4 }
  0x7b   : > { %p531_p7 = por %p530_p3, %p529_p1 }
  0x7c   : > { %p527_p12 = pneg %p526_p10 }
  0x7d   : > { %p533_p11 = por %p532_p2, %p531_p7 }
  0x7f   : > { %p534_p13 = pnand %p533_p11, %p527_p12 }
  0x81   : > { %537 = shalt.err (!%p534_p13)
}
  0x82   : > { %373 = dma.vmem_to_hbm [thread:$0]  (%p849_p4), %s780_s17, 128, %s785_s14, %s249_s9  }
  0x83 PF: > { %p390_p0 = scmp.ge.s32.totalorder %s598_s27, 2  ;;  %s275_s10 = sand.u32 1, %s578_s22  }
  0x84   : > { %p850_p5 = scmp.ne.s32.totalorder %s841_s6, 0  ;;  %s276_s15 = scalar_lea.sflag [#allocation6], %s275_s10 }
  0x86   : > { %p383_p6 = pnand %p390_p0, %p850_p5 }
  0x88   : > { %573 = dma.done.wait (!%p383_p6), %s276_s15, 128  }
  0x89   : > { %575 = vsyncadd (!%p383_p6), %s276_s15, 4294967168  ;;  %s22_s27 = sadd.s32 1, %s598_s27   ;;  %s851_s22 = smov %s582_s23 }
  0x8a   : > { %p19_p8 = scmp.ge.s32.totalorder %s22_s27, 4   ;;  %s852_s23 = smov %s586_s24 }
  0x8b   : > { %s853_s24 = smov %s691_s7  ;;  %s854_s25 = smov %s594_s26 }
  0x8c   : > { %s855_s26 = smov %s857_s29  ;;  %21 = sbr.rel (!%p19_p8) target bundleno = 18 (0x12), region = 78 }
  0x93   :  { %281 = vsyncpa [#allocation5], 1 }
  0x94   :  { %283 = vsyncpa [#allocation5 + $0x1], 1 }
  0x95   :  { %284 = vsyncpa [#allocation8], 1 }
  0x96   :  { %285 = vsyncpa [#allocation6], 1 }
  0x97   :  { %287 = vsyncpa [#allocation6 + $0x1], 1 }

</bundles_post_ra>
